<compile_context>
chip_gen: v6e
topology: v6e:2x2x1
jax: 0.10.0
libtpu: 0.0.40
codegen_flags: <defaults>
</compile_context>

<pallas_src>
import jax
import jax.numpy as jnp
from jax.experimental import pallas as pl
from jax.experimental.pallas import tpu as pltpu


# ----------------------------------------------------------------------------
# Pallas kernel: one batch tile of z = x @ W  (pure MXU matmul, f32 accumulate)
# ----------------------------------------------------------------------------
def inv1x1_matmul_kernel(x_ref, w_ref, z_ref):
    z_ref[...] = jnp.dot(
        x_ref[...], w_ref[...], preferred_element_type=jnp.float32
    ).astype(z_ref.dtype)


# ----------------------------------------------------------------------------
# Wrapper: tiling, pallas_call, log_det
# ----------------------------------------------------------------------------
def _round_up(n, m):
    return ((n + m - 1) // m) * m


def invertible_1x1_forward(x, W, S, *, tile_b=None, compute_dtype=None,
                           out_dtype=None):
    """x: (B, D), W: (D, D), S: (D,)  ->  (z (B, D), log_det scalar f32)."""
    B, D = x.shape

    if compute_dtype is None:
        # Small D is HBM-bound: keep the input dtype (and full W precision —
        # important for an invertible-flow layer's round-trip error).
        # Large D is MXU-bound: bf16 inputs with f32 accumulation hit bf16 MXU
        # peak on v5e/v6e/v7x and also halve the x read bytes.
        compute_dtype = jnp.bfloat16 if D >= 512 else x.dtype
    if out_dtype is None:
        out_dtype = x.dtype

    in_bytes = jnp.dtype(compute_dtype).itemsize
    out_bytes = jnp.dtype(out_dtype).itemsize

    # Sub-32-bit dtypes pack along sublanes: round batch tiles to the packing
    # multiple (8 for f32, 16 for bf16, 32 for int8/fp8).
    sub_mult = max(8, 32 // max(in_bytes, 1))

    if tile_b is None:
        # Target ~4 MiB of x per tile so the fixed ~0.35 us per-grid-step cost
        # is amortized (dominant otherwise on v7x's 3.2 TB/s HBM); keep the M
        # tile a multiple of 256 for full 256-wide MXU passes on v6e/v7x.
        tile_b = max(512, (4 << 20) // max(D * in_bytes, 1))
        tile_b = _round_up(tile_b, 256)
        # Give a 2-TC (megacore / v7x) part at least two batch tiles to split
        # whenever each half is still a decently sized tile.
        half = _round_up(-(-B // 2), 256)
        if half >= 512:
            tile_b = min(tile_b, half)

    # Clamp to the batch.  A full-extent block (== B) is always legal; blocks
    # smaller than the array must keep the sublane-packing multiple.
    tile_b = min(int(tile_b), B)
    if tile_b < B:
        tile_b = max((tile_b // sub_mult) * sub_mult, sub_mult)
        if tile_b >= B:
            tile_b = B

    grid = (pl.cdiv(B, tile_b),)  # last tile may be partial; rows independent

    xc = x.astype(compute_dtype)   # no-op when dtypes already match
    Wc = W.astype(compute_dtype)

    # Single-buffer the resident weight once its footprint matters (constant
    # index_map -> never re-fetched).  Halves W's VMEM cost, which matters on
    # v7x's 64 MiB/TC for large D.  Guarded so small-D calls use the plain,
    # battle-tested default-buffered path.
    w_bytes = D * D * in_bytes
    if w_bytes >= (8 << 20):
        w_spec = pl.BlockSpec((D, D), lambda i: (0, 0),
                              pipeline_mode=pl.Buffered(1))
        w_bufs = 1
    else:
        w_spec = pl.BlockSpec((D, D), lambda i: (0, 0))
        w_bufs = 2

    # VMEM budget from the actual buffered footprint (+2 MiB slack for
    # Mosaic-internal scratch) so the same code is safe on v7x (64 MiB/TC).
    vmem_bytes = (2 * tile_b * D * in_bytes        # x, double buffered
                  + 2 * tile_b * D * out_bytes     # z, double buffered
                  + w_bufs * w_bytes               # W, resident
                  + (2 << 20))
    vmem_bytes = int(max(vmem_bytes, 4 << 20))

    cost = pl.CostEstimate(
        flops=2 * B * D * D,
        bytes_accessed=B * D * (in_bytes + out_bytes) + w_bytes,
        transcendentals=0,
    )

    z = pl.pallas_call(
        inv1x1_matmul_kernel,
        out_shape=jax.ShapeDtypeStruct((B, D), out_dtype),
        grid=grid,
        in_specs=[
            # x: stream batch tiles; last dim = full D (legal for any D, no
            # HBM padding).  D % 128 != 0 only costs a masked vst on z, which
            # is fine in the bandwidth-bound small-D regime.
            pl.BlockSpec((tile_b, D), lambda i: (i, 0)),
            w_spec,                                   # W: resident across grid
        ],
        out_specs=pl.BlockSpec((tile_b, D), lambda i: (i, 0)),
        compiler_params=pltpu.CompilerParams(
            # TODO(synk): if profiling on a 2-TC part shows only one core busy,
            # switch this axis to pltpu.CORE_PARALLEL (or an explicit core_map)
            # — plain "parallel" vs "arbitrary" is a near-no-op in codegen.
            dimension_semantics=("parallel",),
            vmem_limit_bytes=vmem_bytes,
        ),
        cost_estimate=cost,
    )(xc, Wc)

    # NOTE: if W ever stops fitting in VMEM (f32 W is comfortable up to
    # roughly D ~ 2048-2560 on v7x (64 MiB/TC) and ~3500-4000 on v5e/v6e),
    # split the output-column axis with a 2-D grid and a (D, tile_n) W block
    # (which also shrinks the z tile); no K-axis accumulator / pl.when needed.

    # log|det W| = sum(log|S|): O(D), x-independent -> computed once in plain
    # JAX, not redundantly per grid step inside the kernel.
    log_det = jnp.sum(jnp.log(jnp.abs(S.astype(jnp.float32))))
    return z, log_det


# ----------------------------------------------------------------------------
# Parameter construction (deterministic, mirrors Invertible1x1Conv.__init__)
# ----------------------------------------------------------------------------
def make_params(dim, key):
    A = jax.random.normal(key, (dim, dim), dtype=jnp.float32)
    Q, _ = jnp.linalg.qr(A)                      # orthogonal init
    P, L, U = jax.scipy.linalg.lu(Q)             # L has unit diagonal
    S = jnp.diag(U)                              # learnable in torch
    U = jnp.triu(U, k=1)                         # strictly upper (learnable)
    return (P.astype(jnp.float32), L.astype(jnp.float32),
            S.astype(jnp.float32), U.astype(jnp.float32))


def assemble_W(P, L, S, U, dim):
    """Same as Invertible1x1Conv._assemble_W."""
    L_ = jnp.tril(L, k=-1) + jnp.eye(dim, dtype=L.dtype)
    U_ = jnp.triu(U, k=1)
    return P @ L_ @ (U_ + jnp.diag(S))


# ----------------------------------------------------------------------------
# Driver
# ----------------------------------------------------------------------------
if __name__ == "__main__":
    dim = 8
    batch = 16

    # Deterministic parameters and input.
    P, L, S, U = make_params(dim, jax.random.PRNGKey(42))
    W = assemble_W(P, L, S, U, dim)
    x = jax.random.normal(jax.random.PRNGKey(0), (batch, dim), dtype=jnp.float32)

    z, log_det = invertible_1x1_forward(x, W, S)
    z = jax.block_until_ready(z)
    log_det = jax.block_until_ready(log_det)

    # Reference check (plain JAX) — same math as the PyTorch forward.
    z_ref = x @ W
    log_det_ref = jnp.sum(jnp.log(jnp.abs(S)))
    assert z.shape == (batch, dim)
    assert z.dtype == x.dtype
    assert jnp.allclose(z, z_ref, atol=1e-5, rtol=1e-5)
    assert jnp.allclose(log_det, log_det_ref, atol=1e-6, rtol=1e-6)

    print("KERNEL_OK")
</pallas_src>

<mosaic_0001>
module attributes {stable_mosaic.version = 11 : i64} {
  func.func @inv1x1_matmul_kernel(%arg0: i32, %arg1: memref<16x8xf32, #tpu.memory_space<vmem>>, %arg2: memref<8x8xf32, #tpu.memory_space<vmem>>, %arg3: memref<16x8xf32, #tpu.memory_space<vmem>>) attributes {dimension_semantics = [#tpu.dimension_semantics<parallel>], iteration_bounds = array<i64: 1>, scalar_prefetch = 0 : i64, scratch_operands = 0 : i64, tpu.core_type = #tpu.core_type<tc>, window_params = [{transform_indices = @transform_0, window_bounds = array<i64: 16, 8>}, {pipeline_mode = #tpu.pipeline_mode<synchronous>, transform_indices = @transform_1, window_bounds = array<i64: 8, 8>}, {transform_indices = @transform_2, window_bounds = array<i64: 16, 8>}]} {
    %c0 = arith.constant 0 : index
    %c0_0 = arith.constant 0 : index
    %0 = vector.load %arg1[%c0, %c0_0] : memref<16x8xf32, #tpu.memory_space<vmem>>, vector<16x8xf32>
    %c0_1 = arith.constant 0 : index
    %c0_2 = arith.constant 0 : index
    %1 = vector.load %arg2[%c0_1, %c0_2] : memref<8x8xf32, #tpu.memory_space<vmem>>, vector<8x8xf32>
    %cst = arith.constant dense<0.000000e+00> : vector<16x8xf32>
    %2 = tpu.matmul %0, %1, %cst {dimension_numbers = #tpu.dot_dimension_numbers<[1], [0], [0], [1], [0, 0, 1, 1], [], []>} : vector<16x8xf32>, vector<8x8xf32>, vector<16x8xf32> -> vector<16x8xf32>
    %c0_3 = arith.constant 0 : index
    %c0_4 = arith.constant 0 : index
    %3 = vector.load %arg3[%c0_3, %c0_4] : memref<16x8xf32, #tpu.memory_space<vmem>>, vector<16x8xf32>
    tpu.vector_store %arg3[%c0_3, %c0_4], %2 {strides = array<i32>} : memref<16x8xf32, #tpu.memory_space<vmem>>, vector<16x8xf32>,
    return
  }
  func.func @transform_0(%arg0: i32) -> (i32, i32) {
    %c0_i32 = arith.constant 0 : i32
    %c0_i32_0 = arith.constant 0 : i32
    return %arg0, %c0_i32 : i32, i32
  }
  func.func @transform_1(%arg0: i32) -> (i32, i32) {
    %c0_i32 = arith.constant 0 : i32
    %c0_i32_0 = arith.constant 0 : i32
    %c0_i32_1 = arith.constant 0 : i32
    return %c0_i32, %c0_i32_0 : i32, i32
  }
  func.func @transform_2(%arg0: i32) -> (i32, i32) {
    %c0_i32 = arith.constant 0 : i32
    %c0_i32_0 = arith.constant 0 : i32
    return %arg0, %c0_i32 : i32, i32
  }
}

</mosaic_0001>

<bundles_post_ra>
// kernel: tpu_custom_call.1
= control target key start
LH: loop header
LB: loop body
LE: loop exit
PB: predicated region body
PF: predicated region fallthrough
CT: control target
= control target key end

     0   :  { %vm14_vm0 = vcmask 64512   ;;  %s142_s1 = inlined_call_operand.vmem [shape: f32[8,8], index: 1, kind: input, shape index: {}]   ;;  %s143_s0 = inlined_call_operand.vmem [shape: f32[16,8], index: 0, kind: input, shape index: {}]   ;;  %s144_s2 = inlined_call_operand.vmem [shape: f32[16,8], index: 2, kind: output, shape index: {}]  }
   0x1   :  { %v13_v0 = vld [vmem:[%s142_s1] sm:$0xff]  ;;  %v12_v2 = vld [vmem:[%s143_s0 + $0x8] sm:$0xff] }
   0x2   :  { %v11_v1 = vld [vmem:[%s143_s0] sm:$0xff]  ;;  %107 = vmatprep.subr.mxu0 %v13_v0 }
   0x3   :  { %109 = vmatprep.mubr.msk.f32.mxu0 %vm14_vm0, %v11_v1  ;;  %108 = vmatpush3.msra.mxu0 %v13_v0 }
   0x4   :  { %110 = vmatmul.mubr.msk.f32.vlgmr.msra.gmra.mxu0 %vm14_vm0, %v12_v2 }
  0xc4   :  { %v111_v3 = vpop.f32.mrf.mxu0 }
  0xc5   :  { %97 = vst.msk [vmem:[%s144_s2 + $0x8] sm:$0xff] %vm14_vm0, %v111_v3 }
  0xc6   :  { %v87_v4 = vpop.f32.mrf.mxu0 }
  0xc7   :  { %96 = vst.msk [vmem:[%s144_s2] sm:$0xff] %vm14_vm0, %v87_v4 }

</bundles_post_ra>
